<compile_context>
chip_gen: v7x
topology: tpu7x:2x2x1
jax: 0.10.0
libtpu: 0.0.40
codegen_flags: <defaults>
</compile_context>

<pallas_src>
import jax
import jax.numpy as jnp
from jax.experimental import pallas as pl
from jax.experimental.pallas import tpu as pltpu

LANE = 128


def simple_cnn_kernel(convw_ref, fcw_ref, fcb_ref, x_ref, out_ref):
    # convw_ref: SMEM (4,)  flattened 2x2 conv kernel [w00, w01, w10, w11]
    # fcw_ref:   SMEM (8,)  fc weight row-major       [W00..W03, W10..W13]
    # fcb_ref:   SMEM (2,)  fc bias
    # x_ref:     VMEM (16, TILE_NB, 128)   row r = pixel, (nb, lane) = batch samples
    # out_ref:   VMEM (2,  TILE_NB, 128)
    w00 = convw_ref[0]
    w01 = convw_ref[1]
    w10 = convw_ref[2]
    w11 = convw_ref[3]

    # Load each pixel row once as a dense (TILE_NB, 128) slab.
    xr = [x_ref[r] for r in range(16)]

    # Conv2d(k=2, valid): 9 outputs, each a dense slab (pure VPU multiply-adds).
    def conv(h, w):
        r = h * 4 + w
        return (w00 * xr[r] + w01 * xr[r + 1]
                + w10 * xr[r + 4] + w11 * xr[r + 5])

    c = [[conv(h, w) for w in range(3)] for h in range(3)]

    # MaxPool2d(2, stride=1) with ReLU fused in (relu is monotone => relu(max)==max(relu)).
    def pool_relu(i, j):
        m = jnp.maximum(jnp.maximum(c[i][j], c[i][j + 1]),
                        jnp.maximum(c[i + 1][j], c[i + 1][j + 1]))
        return jnp.maximum(m, 0.0)

    # PyTorch .view(B, -1) order of the 2x2 pooled map.
    p = [pool_relu(0, 0), pool_relu(0, 1), pool_relu(1, 0), pool_relu(1, 1)]

    # Linear(4, 2) on the VPU with SMEM scalar weights (no MXU for a 4x2 matmul).
    for k in range(2):
        out_k = (fcw_ref[4 * k + 0] * p[0] + fcw_ref[4 * k + 1] * p[1]
                 + fcw_ref[4 * k + 2] * p[2] + fcw_ref[4 * k + 3] * p[3]
                 + fcb_ref[k])
        out_ref[k] = out_k.astype(out_ref.dtype)   # dense (TILE_NB, 128) store


def simple_cnn_forward(x, conv_w, fc_w, fc_b, tile_b=32768):
    """x: (B, 1, 4, 4) NCHW float32.  Returns (B, 2) float32."""
    B = x.shape[0]
    nb = pl.cdiv(B, LANE)                     # number of 128-sample slabs
    tile_nb = max(1, min(tile_b // LANE, nb))
    if nb >= 2:
        # keep >=2 grid steps so both v7x TensorCores are used (harmless on v5e/v6e)
        tile_nb = min(tile_nb, max(1, nb // 2))
    nb_pad = pl.cdiv(nb, tile_nb) * tile_nb
    b_pad = nb_pad * LANE
    grid = (nb_pad // tile_nb,)

    # Layout plumbing: (B,1,4,4) -> (16, nb_pad, 128), batch on sublanes+lanes.
    # TODO(synk): have the upstream producer emit this layout directly to drop this XLA-side pass.
    xt = x[:, 0, :, :].reshape(B, 16).astype(jnp.float32)
    if b_pad > B:
        xt = jnp.pad(xt, ((0, b_pad - B), (0, 0)))            # pad only to tile granule
    xt = xt.reshape(nb_pad, LANE, 16).transpose(2, 0, 1)      # (16, nb_pad, 128)

    convw = conv_w.reshape(-1).astype(jnp.float32)   # (4,)
    fcw = fc_w.reshape(-1).astype(jnp.float32)       # (8,)
    fcb = fc_b.reshape(-1).astype(jnp.float32)       # (2,)

    out_3d = pl.pallas_call(
        simple_cnn_kernel,
        out_shape=jax.ShapeDtypeStruct((2, nb_pad, LANE), jnp.float32),
        grid=grid,
        in_specs=[
            pl.BlockSpec(memory_space=pltpu.MemorySpace.SMEM),     # conv weight scalars
            pl.BlockSpec(memory_space=pltpu.MemorySpace.SMEM),     # fc weight scalars
            pl.BlockSpec(memory_space=pltpu.MemorySpace.SMEM),     # fc bias scalars
            pl.BlockSpec((16, tile_nb, LANE), lambda i: (0, i, 0)),  # x: dense batch slabs
        ],
        out_specs=pl.BlockSpec((2, tile_nb, LANE), lambda i: (0, i, 0)),
        compiler_params=pltpu.CompilerParams(
            dimension_semantics=("parallel",)),                    # batch axis megacore-shardable
    )(convw, fcw, fcb, xt)

    # (2, nb_pad, 128) -> (2, b_pad) -> (B, 2)
    return out_3d.reshape(2, b_pad)[:, :B].T


def simple_cnn_reference(x, conv_w, fc_w, fc_b):
    """Pure-JAX reference mirroring the PyTorch forward (for correctness check)."""
    xs = x[:, 0, :, :]
    conv = (conv_w[0, 0] * xs[:, 0:3, 0:3] + conv_w[0, 1] * xs[:, 0:3, 1:4]
            + conv_w[1, 0] * xs[:, 1:4, 0:3] + conv_w[1, 1] * xs[:, 1:4, 1:4])
    act = jnp.maximum(conv, 0.0)
    pool = jnp.maximum(
        jnp.maximum(act[:, 0:2, 0:2], act[:, 0:2, 1:3]),
        jnp.maximum(act[:, 1:3, 0:2], act[:, 1:3, 1:3]),
    )
    flat = pool.reshape(x.shape[0], -1)
    return flat @ fc_w.T + fc_b


if __name__ == "__main__":
    # Deterministic parameters from the module's __init__.
    conv_w = jnp.array([[1.0, 0.5], [0.5, 1.0]], dtype=jnp.float32)          # (2, 2)
    fc_w = jnp.array([[0.1, 0.2, 0.3, 0.4], [0.4, 0.3, 0.2, 0.1]],
                     dtype=jnp.float32)                                      # (2, 4)
    fc_b = jnp.array([0.1, -0.1], dtype=jnp.float32)                         # (2,)

    # Linear(4, 2) after MaxPool2d(2, stride=1) after Conv2d(k=2) implies a
    # 4x4 spatial input with a single channel: (B, 1, 4, 4).
    key = jax.random.PRNGKey(0)
    x = jax.random.normal(key, (2, 1, 4, 4), dtype=jnp.float32)

    out = simple_cnn_forward(x, conv_w, fc_w, fc_b)
    out = jax.block_until_ready(out)

    ref = simple_cnn_reference(x, conv_w, fc_w, fc_b)
    assert out.shape == (2, 2), out.shape
    assert jnp.allclose(out, ref, atol=1e-5, rtol=1e-5), (out, ref)

    print("KERNEL_OK")
</pallas_src>

<mosaic_0001>
module attributes {stable_mosaic.version = 11 : i64} {
  func.func @simple_cnn_kernel(%arg0: i32, %arg1: memref<4xf32, #tpu.memory_space<smem>>, %arg2: memref<8xf32, #tpu.memory_space<smem>>, %arg3: memref<2xf32, #tpu.memory_space<smem>>, %arg4: memref<16x1x128xf32, #tpu.memory_space<vmem>>, %arg5: memref<2x1x128xf32, #tpu.memory_space<vmem>>) attributes {dimension_semantics = [#tpu.dimension_semantics<parallel>], iteration_bounds = array<i64: 1>, scalar_prefetch = 0 : i64, scratch_operands = 0 : i64, tpu.core_type = #tpu.core_type<tc>, window_params = [{transform_indices = @transform_0, window_bounds = array<i64: 4>}, {transform_indices = @transform_1, window_bounds = array<i64: 8>}, {transform_indices = @transform_2, window_bounds = array<i64: 2>}, {transform_indices = @transform_3, window_bounds = array<i64: 16, 1, 128>}, {transform_indices = @transform_4, window_bounds = array<i64: 2, 1, 128>}]} {
    %c0 = arith.constant 0 : index
    %0 = memref.load %arg1[%c0] : memref<4xf32, #tpu.memory_space<smem>>
    %c1 = arith.constant 1 : index
    %1 = memref.load %arg1[%c1] : memref<4xf32, #tpu.memory_space<smem>>
    %c2 = arith.constant 2 : index
    %2 = memref.load %arg1[%c2] : memref<4xf32, #tpu.memory_space<smem>>
    %c3 = arith.constant 3 : index
    %3 = memref.load %arg1[%c3] : memref<4xf32, #tpu.memory_space<smem>>
    %c0_0 = arith.constant 0 : index
    %c0_1 = arith.constant 0 : index
    %c0_2 = arith.constant 0 : index
    %4 = vector.load %arg4[%c0_0, %c0_1, %c0_2] : memref<16x1x128xf32, #tpu.memory_space<vmem>>, vector<1x1x128xf32>
    %5 = vector.shape_cast %4 : vector<1x1x128xf32> to vector<1x128xf32>
    %c1_3 = arith.constant 1 : index
    %c0_4 = arith.constant 0 : index
    %c0_5 = arith.constant 0 : index
    %6 = vector.load %arg4[%c1_3, %c0_4, %c0_5] : memref<16x1x128xf32, #tpu.memory_space<vmem>>, vector<1x1x128xf32>
    %7 = vector.shape_cast %6 : vector<1x1x128xf32> to vector<1x128xf32>
    %c2_6 = arith.constant 2 : index
    %c0_7 = arith.constant 0 : index
    %c0_8 = arith.constant 0 : index
    %8 = vector.load %arg4[%c2_6, %c0_7, %c0_8] : memref<16x1x128xf32, #tpu.memory_space<vmem>>, vector<1x1x128xf32>
    %9 = vector.shape_cast %8 : vector<1x1x128xf32> to vector<1x128xf32>
    %c3_9 = arith.constant 3 : index
    %c0_10 = arith.constant 0 : index
    %c0_11 = arith.constant 0 : index
    %10 = vector.load %arg4[%c3_9, %c0_10, %c0_11] : memref<16x1x128xf32, #tpu.memory_space<vmem>>, vector<1x1x128xf32>
    %11 = vector.shape_cast %10 : vector<1x1x128xf32> to vector<1x128xf32>
    %c4 = arith.constant 4 : index
    %c0_12 = arith.constant 0 : index
    %c0_13 = arith.constant 0 : index
    %12 = vector.load %arg4[%c4, %c0_12, %c0_13] : memref<16x1x128xf32, #tpu.memory_space<vmem>>, vector<1x1x128xf32>
    %13 = vector.shape_cast %12 : vector<1x1x128xf32> to vector<1x128xf32>
    %c5 = arith.constant 5 : index
    %c0_14 = arith.constant 0 : index
    %c0_15 = arith.constant 0 : index
    %14 = vector.load %arg4[%c5, %c0_14, %c0_15] : memref<16x1x128xf32, #tpu.memory_space<vmem>>, vector<1x1x128xf32>
    %15 = vector.shape_cast %14 : vector<1x1x128xf32> to vector<1x128xf32>
    %c6 = arith.constant 6 : index
    %c0_16 = arith.constant 0 : index
    %c0_17 = arith.constant 0 : index
    %16 = vector.load %arg4[%c6, %c0_16, %c0_17] : memref<16x1x128xf32, #tpu.memory_space<vmem>>, vector<1x1x128xf32>
    %17 = vector.shape_cast %16 : vector<1x1x128xf32> to vector<1x128xf32>
    %c7 = arith.constant 7 : index
    %c0_18 = arith.constant 0 : index
    %c0_19 = arith.constant 0 : index
    %18 = vector.load %arg4[%c7, %c0_18, %c0_19] : memref<16x1x128xf32, #tpu.memory_space<vmem>>, vector<1x1x128xf32>
    %19 = vector.shape_cast %18 : vector<1x1x128xf32> to vector<1x128xf32>
    %c8 = arith.constant 8 : index
    %c0_20 = arith.constant 0 : index
    %c0_21 = arith.constant 0 : index
    %20 = vector.load %arg4[%c8, %c0_20, %c0_21] : memref<16x1x128xf32, #tpu.memory_space<vmem>>, vector<1x1x128xf32>
    %21 = vector.shape_cast %20 : vector<1x1x128xf32> to vector<1x128xf32>
    %c9 = arith.constant 9 : index
    %c0_22 = arith.constant 0 : index
    %c0_23 = arith.constant 0 : index
    %22 = vector.load %arg4[%c9, %c0_22, %c0_23] : memref<16x1x128xf32, #tpu.memory_space<vmem>>, vector<1x1x128xf32>
    %23 = vector.shape_cast %22 : vector<1x1x128xf32> to vector<1x128xf32>
    %c10 = arith.constant 10 : index
    %c0_24 = arith.constant 0 : index
    %c0_25 = arith.constant 0 : index
    %24 = vector.load %arg4[%c10, %c0_24, %c0_25] : memref<16x1x128xf32, #tpu.memory_space<vmem>>, vector<1x1x128xf32>
    %25 = vector.shape_cast %24 : vector<1x1x128xf32> to vector<1x128xf32>
    %c11 = arith.constant 11 : index
    %c0_26 = arith.constant 0 : index
    %c0_27 = arith.constant 0 : index
    %26 = vector.load %arg4[%c11, %c0_26, %c0_27] : memref<16x1x128xf32, #tpu.memory_space<vmem>>, vector<1x1x128xf32>
    %27 = vector.shape_cast %26 : vector<1x1x128xf32> to vector<1x128xf32>
    %c12 = arith.constant 12 : index
    %c0_28 = arith.constant 0 : index
    %c0_29 = arith.constant 0 : index
    %28 = vector.load %arg4[%c12, %c0_28, %c0_29] : memref<16x1x128xf32, #tpu.memory_space<vmem>>, vector<1x1x128xf32>
    %29 = vector.shape_cast %28 : vector<1x1x128xf32> to vector<1x128xf32>
    %c13 = arith.constant 13 : index
    %c0_30 = arith.constant 0 : index
    %c0_31 = arith.constant 0 : index
    %30 = vector.load %arg4[%c13, %c0_30, %c0_31] : memref<16x1x128xf32, #tpu.memory_space<vmem>>, vector<1x1x128xf32>
    %31 = vector.shape_cast %30 : vector<1x1x128xf32> to vector<1x128xf32>
    %c14 = arith.constant 14 : index
    %c0_32 = arith.constant 0 : index
    %c0_33 = arith.constant 0 : index
    %32 = vector.load %arg4[%c14, %c0_32, %c0_33] : memref<16x1x128xf32, #tpu.memory_space<vmem>>, vector<1x1x128xf32>
    %33 = vector.shape_cast %32 : vector<1x1x128xf32> to vector<1x128xf32>
    %c15 = arith.constant 15 : index
    %c0_34 = arith.constant 0 : index
    %c0_35 = arith.constant 0 : index
    %34 = vector.load %arg4[%c15, %c0_34, %c0_35] : memref<16x1x128xf32, #tpu.memory_space<vmem>>, vector<1x1x128xf32>
    %35 = vector.shape_cast %34 : vector<1x1x128xf32> to vector<1x128xf32>
    %36 = vector.broadcast %0 : f32 to vector<1x128xf32>
    %37 = arith.mulf %36, %5 : vector<1x128xf32>
    %38 = vector.broadcast %1 : f32 to vector<1x128xf32>
    %39 = arith.mulf %38, %7 : vector<1x128xf32>
    %40 = arith.addf %37, %39 : vector<1x128xf32>
    %41 = vector.broadcast %2 : f32 to vector<1x128xf32>
    %42 = arith.mulf %41, %13 : vector<1x128xf32>
    %43 = arith.addf %40, %42 : vector<1x128xf32>
    %44 = vector.broadcast %3 : f32 to vector<1x128xf32>
    %45 = arith.mulf %44, %15 : vector<1x128xf32>
    %46 = arith.addf %43, %45 : vector<1x128xf32>
    %47 = vector.broadcast %0 : f32 to vector<1x128xf32>
    %48 = arith.mulf %47, %7 : vector<1x128xf32>
    %49 = vector.broadcast %1 : f32 to vector<1x128xf32>
    %50 = arith.mulf %49, %9 : vector<1x128xf32>
    %51 = arith.addf %48, %50 : vector<1x128xf32>
    %52 = vector.broadcast %2 : f32 to vector<1x128xf32>
    %53 = arith.mulf %52, %15 : vector<1x128xf32>
    %54 = arith.addf %51, %53 : vector<1x128xf32>
    %55 = vector.broadcast %3 : f32 to vector<1x128xf32>
    %56 = arith.mulf %55, %17 : vector<1x128xf32>
    %57 = arith.addf %54, %56 : vector<1x128xf32>
    %58 = vector.broadcast %0 : f32 to vector<1x128xf32>
    %59 = arith.mulf %58, %9 : vector<1x128xf32>
    %60 = vector.broadcast %1 : f32 to vector<1x128xf32>
    %61 = arith.mulf %60, %11 : vector<1x128xf32>
    %62 = arith.addf %59, %61 : vector<1x128xf32>
    %63 = vector.broadcast %2 : f32 to vector<1x128xf32>
    %64 = arith.mulf %63, %17 : vector<1x128xf32>
    %65 = arith.addf %62, %64 : vector<1x128xf32>
    %66 = vector.broadcast %3 : f32 to vector<1x128xf32>
    %67 = arith.mulf %66, %19 : vector<1x128xf32>
    %68 = arith.addf %65, %67 : vector<1x128xf32>
    %69 = vector.broadcast %0 : f32 to vector<1x128xf32>
    %70 = arith.mulf %69, %13 : vector<1x128xf32>
    %71 = vector.broadcast %1 : f32 to vector<1x128xf32>
    %72 = arith.mulf %71, %15 : vector<1x128xf32>
    %73 = arith.addf %70, %72 : vector<1x128xf32>
    %74 = vector.broadcast %2 : f32 to vector<1x128xf32>
    %75 = arith.mulf %74, %21 : vector<1x128xf32>
    %76 = arith.addf %73, %75 : vector<1x128xf32>
    %77 = vector.broadcast %3 : f32 to vector<1x128xf32>
    %78 = arith.mulf %77, %23 : vector<1x128xf32>
    %79 = arith.addf %76, %78 : vector<1x128xf32>
    %80 = vector.broadcast %0 : f32 to vector<1x128xf32>
    %81 = arith.mulf %80, %15 : vector<1x128xf32>
    %82 = vector.broadcast %1 : f32 to vector<1x128xf32>
    %83 = arith.mulf %82, %17 : vector<1x128xf32>
    %84 = arith.addf %81, %83 : vector<1x128xf32>
    %85 = vector.broadcast %2 : f32 to vector<1x128xf32>
    %86 = arith.mulf %85, %23 : vector<1x128xf32>
    %87 = arith.addf %84, %86 : vector<1x128xf32>
    %88 = vector.broadcast %3 : f32 to vector<1x128xf32>
    %89 = arith.mulf %88, %25 : vector<1x128xf32>
    %90 = arith.addf %87, %89 : vector<1x128xf32>
    %91 = vector.broadcast %0 : f32 to vector<1x128xf32>
    %92 = arith.mulf %91, %17 : vector<1x128xf32>
    %93 = vector.broadcast %1 : f32 to vector<1x128xf32>
    %94 = arith.mulf %93, %19 : vector<1x128xf32>
    %95 = arith.addf %92, %94 : vector<1x128xf32>
    %96 = vector.broadcast %2 : f32 to vector<1x128xf32>
    %97 = arith.mulf %96, %25 : vector<1x128xf32>
    %98 = arith.addf %95, %97 : vector<1x128xf32>
    %99 = vector.broadcast %3 : f32 to vector<1x128xf32>
    %100 = arith.mulf %99, %27 : vector<1x128xf32>
    %101 = arith.addf %98, %100 : vector<1x128xf32>
    %102 = vector.broadcast %0 : f32 to vector<1x128xf32>
    %103 = arith.mulf %102, %21 : vector<1x128xf32>
    %104 = vector.broadcast %1 : f32 to vector<1x128xf32>
    %105 = arith.mulf %104, %23 : vector<1x128xf32>
    %106 = arith.addf %103, %105 : vector<1x128xf32>
    %107 = vector.broadcast %2 : f32 to vector<1x128xf32>
    %108 = arith.mulf %107, %29 : vector<1x128xf32>
    %109 = arith.addf %106, %108 : vector<1x128xf32>
    %110 = vector.broadcast %3 : f32 to vector<1x128xf32>
    %111 = arith.mulf %110, %31 : vector<1x128xf32>
    %112 = arith.addf %109, %111 : vector<1x128xf32>
    %113 = vector.broadcast %0 : f32 to vector<1x128xf32>
    %114 = arith.mulf %113, %23 : vector<1x128xf32>
    %115 = vector.broadcast %1 : f32 to vector<1x128xf32>
    %116 = arith.mulf %115, %25 : vector<1x128xf32>
    %117 = arith.addf %114, %116 : vector<1x128xf32>
    %118 = vector.broadcast %2 : f32 to vector<1x128xf32>
    %119 = arith.mulf %118, %31 : vector<1x128xf32>
    %120 = arith.addf %117, %119 : vector<1x128xf32>
    %121 = vector.broadcast %3 : f32 to vector<1x128xf32>
    %122 = arith.mulf %121, %33 : vector<1x128xf32>
    %123 = arith.addf %120, %122 : vector<1x128xf32>
    %124 = vector.broadcast %0 : f32 to vector<1x128xf32>
    %125 = arith.mulf %124, %25 : vector<1x128xf32>
    %126 = vector.broadcast %1 : f32 to vector<1x128xf32>
    %127 = arith.mulf %126, %27 : vector<1x128xf32>
    %128 = arith.addf %125, %127 : vector<1x128xf32>
    %129 = vector.broadcast %2 : f32 to vector<1x128xf32>
    %130 = arith.mulf %129, %33 : vector<1x128xf32>
    %131 = arith.addf %128, %130 : vector<1x128xf32>
    %132 = vector.broadcast %3 : f32 to vector<1x128xf32>
    %133 = arith.mulf %132, %35 : vector<1x128xf32>
    %134 = arith.addf %131, %133 : vector<1x128xf32>
    %135 = arith.maximumf %46, %57 : vector<1x128xf32>
    %136 = arith.maximumf %79, %90 : vector<1x128xf32>
    %137 = arith.maximumf %135, %136 : vector<1x128xf32>
    %cst = arith.constant 0.000000e+00 : f32
    %138 = vector.broadcast %cst : f32 to vector<1x128xf32>
    %139 = arith.maximumf %137, %138 : vector<1x128xf32>
    %140 = arith.maximumf %57, %68 : vector<1x128xf32>
    %141 = arith.maximumf %90, %101 : vector<1x128xf32>
    %142 = arith.maximumf %140, %141 : vector<1x128xf32>
    %cst_36 = arith.constant 0.000000e+00 : f32
    %143 = vector.broadcast %cst_36 : f32 to vector<1x128xf32>
    %144 = arith.maximumf %142, %143 : vector<1x128xf32>
    %145 = arith.maximumf %79, %90 : vector<1x128xf32>
    %146 = arith.maximumf %112, %123 : vector<1x128xf32>
    %147 = arith.maximumf %145, %146 : vector<1x128xf32>
    %cst_37 = arith.constant 0.000000e+00 : f32
    %148 = vector.broadcast %cst_37 : f32 to vector<1x128xf32>
    %149 = arith.maximumf %147, %148 : vector<1x128xf32>
    %150 = arith.maximumf %90, %101 : vector<1x128xf32>
    %151 = arith.maximumf %123, %134 : vector<1x128xf32>
    %152 = arith.maximumf %150, %151 : vector<1x128xf32>
    %cst_38 = arith.constant 0.000000e+00 : f32
    %153 = vector.broadcast %cst_38 : f32 to vector<1x128xf32>
    %154 = arith.maximumf %152, %153 : vector<1x128xf32>
    %c0_39 = arith.constant 0 : index
    %155 = memref.load %arg2[%c0_39] : memref<8xf32, #tpu.memory_space<smem>>
    %156 = vector.broadcast %155 : f32 to vector<1x128xf32>
    %157 = arith.mulf %156, %139 : vector<1x128xf32>
    %c1_40 = arith.constant 1 : index
    %158 = memref.load %arg2[%c1_40] : memref<8xf32, #tpu.memory_space<smem>>
    %159 = vector.broadcast %158 : f32 to vector<1x128xf32>
    %160 = arith.mulf %159, %144 : vector<1x128xf32>
    %161 = arith.addf %157, %160 : vector<1x128xf32>
    %c2_41 = arith.constant 2 : index
    %162 = memref.load %arg2[%c2_41] : memref<8xf32, #tpu.memory_space<smem>>
    %163 = vector.broadcast %162 : f32 to vector<1x128xf32>
    %164 = arith.mulf %163, %149 : vector<1x128xf32>
    %165 = arith.addf %161, %164 : vector<1x128xf32>
    %c3_42 = arith.constant 3 : index
    %166 = memref.load %arg2[%c3_42] : memref<8xf32, #tpu.memory_space<smem>>
    %167 = vector.broadcast %166 : f32 to vector<1x128xf32>
    %168 = arith.mulf %167, %154 : vector<1x128xf32>
    %169 = arith.addf %165, %168 : vector<1x128xf32>
    %c0_43 = arith.constant 0 : index
    %170 = memref.load %arg3[%c0_43] : memref<2xf32, #tpu.memory_space<smem>>
    %171 = vector.broadcast %170 : f32 to vector<1x128xf32>
    %172 = arith.addf %169, %171 : vector<1x128xf32>
    %c0_44 = arith.constant 0 : index
    %c0_45 = arith.constant 0 : index
    %c0_46 = arith.constant 0 : index
    %173 = vector.load %arg5[%c0_44, %c0_45, %c0_46] : memref<2x1x128xf32, #tpu.memory_space<vmem>>, vector<1x1x128xf32>
    %174 = vector.shape_cast %173 : vector<1x1x128xf32> to vector<1x128xf32>
    %175 = vector.shape_cast %172 : vector<1x128xf32> to vector<1x1x128xf32>
    tpu.vector_store %arg5[%c0_44, %c0_45, %c0_46], %175 {strides = array<i32>} : memref<2x1x128xf32, #tpu.memory_space<vmem>>, vector<1x1x128xf32>,
    %c4_47 = arith.constant 4 : index
    %176 = memref.load %arg2[%c4_47] : memref<8xf32, #tpu.memory_space<smem>>
    %177 = vector.broadcast %176 : f32 to vector<1x128xf32>
    %178 = arith.mulf %177, %139 : vector<1x128xf32>
    %c5_48 = arith.constant 5 : index
    %179 = memref.load %arg2[%c5_48] : memref<8xf32, #tpu.memory_space<smem>>
    %180 = vector.broadcast %179 : f32 to vector<1x128xf32>
    %181 = arith.mulf %180, %144 : vector<1x128xf32>
    %182 = arith.addf %178, %181 : vector<1x128xf32>
    %c6_49 = arith.constant 6 : index
    %183 = memref.load %arg2[%c6_49] : memref<8xf32, #tpu.memory_space<smem>>
    %184 = vector.broadcast %183 : f32 to vector<1x128xf32>
    %185 = arith.mulf %184, %149 : vector<1x128xf32>
    %186 = arith.addf %182, %185 : vector<1x128xf32>
    %c7_50 = arith.constant 7 : index
    %187 = memref.load %arg2[%c7_50] : memref<8xf32, #tpu.memory_space<smem>>
    %188 = vector.broadcast %187 : f32 to vector<1x128xf32>
    %189 = arith.mulf %188, %154 : vector<1x128xf32>
    %190 = arith.addf %186, %189 : vector<1x128xf32>
    %c1_51 = arith.constant 1 : index
    %191 = memref.load %arg3[%c1_51] : memref<2xf32, #tpu.memory_space<smem>>
    %192 = vector.broadcast %191 : f32 to vector<1x128xf32>
    %193 = arith.addf %190, %192 : vector<1x128xf32>
    %c1_52 = arith.constant 1 : index
    %c0_53 = arith.constant 0 : index
    %c0_54 = arith.constant 0 : index
    %194 = vector.load %arg5[%c1_52, %c0_53, %c0_54] : memref<2x1x128xf32, #tpu.memory_space<vmem>>, vector<1x1x128xf32>
    %195 = vector.shape_cast %194 : vector<1x1x128xf32> to vector<1x128xf32>
    %196 = vector.shape_cast %193 : vector<1x128xf32> to vector<1x1x128xf32>
    tpu.vector_store %arg5[%c1_52, %c0_53, %c0_54], %196 {strides = array<i32>} : memref<2x1x128xf32, #tpu.memory_space<vmem>>, vector<1x1x128xf32>,
    return
  }
  func.func @transform_0(%arg0: i32) -> i32 {
    %c0_i32 = arith.constant 0 : i32
    %c0_i32_0 = arith.constant 0 : i32
    return %c0_i32 : i32
  }
  func.func @transform_1(%arg0: i32) -> i32 {
    %c0_i32 = arith.constant 0 : i32
    %c0_i32_0 = arith.constant 0 : i32
    return %c0_i32 : i32
  }
  func.func @transform_2(%arg0: i32) -> i32 {
    %c0_i32 = arith.constant 0 : i32
    %c0_i32_0 = arith.constant 0 : i32
    return %c0_i32 : i32
  }
  func.func @transform_3(%arg0: i32) -> (i32, i32, i32) {
    %c0_i32 = arith.constant 0 : i32
    %c0_i32_0 = arith.constant 0 : i32
    %c0_i32_1 = arith.constant 0 : i32
    return %c0_i32, %arg0, %c0_i32_0 : i32, i32, i32
  }
  func.func @transform_4(%arg0: i32) -> (i32, i32, i32) {
    %c0_i32 = arith.constant 0 : i32
    %c0_i32_0 = arith.constant 0 : i32
    %c0_i32_1 = arith.constant 0 : i32
    return %c0_i32, %arg0, %c0_i32_0 : i32, i32, i32
  }
}

</mosaic_0001>

<bundles_post_ra>
// kernel: tpu_custom_call.1
= control target key start
LH: loop header
LB: loop body
LE: loop exit
PB: predicated region body
PF: predicated region fallthrough
CT: control target
= control target key end

     0   :  { %9 = vsyncpa [#allocation5], 0  ;;  %s496_s0 = inlined_call_operand.hbm [shape: f32[4], index: 0, kind: input, shape index: {}]   ;;  %s497_s1 = inlined_call_operand.vmem [shape: f32[8], index: 1, kind: input, shape index: {}]   ;;  %s498_s2 = inlined_call_operand.vmem [shape: f32[2], index: 2, kind: input, shape index: {}]   ;;  %s499_s3 = inlined_call_operand.hbm [shape: f32[16,1,128], index: 3, kind: input, shape index: {}]   ;;  %s500_s4 = inlined_call_operand.hbm [shape: f32[2,1,128], index: 4, kind: output, shape index: {}]  }
   0x1   :  { %10 = vsyncpa [#allocation6], 0 }
   0x2   :  { %11 = vsyncpa [#allocation9], 0 }
   0x3   :  { %12 = vsyncpa [#allocation3], 0 }
   0x4   :  { %13 = vsyncpa [#allocation4], 0  ;;  %s28_s17 = sshll.u32 %s497_s1, 4  ;;  %s260_s20 = scalar_lea.hbm %s496_s0, 16  ;;  %s29_s17 = int_to_ptr.vmem [resolvable:$true] %s28_s17 }
   0x5   :  { %p261_p0 = scmp.ne.s32.totalorder %s496_s0, %s260_s20  ;;  %p264_p1 = scmp.lt.u32.totalorder %s260_s20, %s496_s0 }
   0x7   :  { %p266_p2 = pnand %p264_p1, %p261_p0 }
   0x9   :  { %269 = shalt.err (!%p266_p2)
}
   0xa   :  { %s348_s25 = smov [#allocation2]   ;;  %s270_s1 = scalar_lea.vmem %s29_s17, 16 }
   0xb   :  { %21 = dma.hbm_to_smem %s496_s0, 16, %s348_s25, [#allocation5]  }
   0xc   :  { %p271_p3 = scmp.ne.s32.totalorder %s29_s17, %s270_s1  ;;  %p275_p4 = scmp.lt.s32.totalorder %s29_s17, %s29_s17 }
   0xd   :  { %p276_p5 = scmp.lt.s32.totalorder %s270_s1, %s270_s1 }
   0xf   :  { %p277_p6 = por %p276_p5, %p275_p4 }
  0x11   :  { %p278_p7 = pnand %p277_p6, %p271_p3 }
  0x13   :  { %281 = shalt.err (!%p278_p7)
}
  0x14   :  { %s349_s28 = smov [#allocation7]   ;;  %s38_s5 = sshll.u32 %s498_s2, 4  ;;  %s39_s5 = int_to_ptr.vmem [resolvable:$true] %s38_s5 }
  0x15   :  { %31 = dma.vmem_to_smem %s29_s17, 16, %s349_s28, [#allocation6]  }
  0x16   :  { %s282_s6 = scalar_lea.vmem %s39_s5, 16  ;;  %p287_p9 = scmp.lt.s32.totalorder %s39_s5, %s39_s5 }
  0x17   :  { %p283_p8 = scmp.ne.s32.totalorder %s39_s5, %s282_s6  ;;  %p288_p10 = scmp.lt.s32.totalorder %s282_s6, %s282_s6 }
  0x19   :  { %p289_p11 = por %p288_p10, %p287_p9 }
  0x1b   :  { %p290_p12 = pnand %p289_p11, %p283_p8 }
  0x1d   :  { %293 = shalt.err (!%p290_p12)
}
  0x1e   :  { %s350_s0 = smov [#allocation8]   ;;  %s351_s7 = smov [#allocation10]  }
  0x1f   :  { %41 = dma.vmem_to_smem %s39_s5, 16, %s350_s0, [#allocation9]  }
  0x20   :  { %s47_s8 = sshll.u32 %s351_s7, 4  ;;  %s294_s11 = scalar_lea.hbm %s499_s3, 256  ;;  %s48_s8 = int_to_ptr.vmem [resolvable:$true] %s47_s8 }
  0x21   :  { %p295_p13 = scmp.ne.s32.totalorder %s499_s3, %s294_s11  ;;  %p298_p0 = scmp.lt.u32.totalorder %s294_s11, %s499_s3 }
  0x23   :  { %p300_p1 = pnand %p298_p0, %p295_p13 }
  0x25   :  { %303 = shalt.err (!%p300_p1)
}
  0x26   :  { %s304_s15 = scalar_lea.vmem %s48_s8, 256  ;;  %p309_p3 = scmp.lt.s32.totalorder %s48_s8, %s48_s8 }
  0x27   :  { %p305_p2 = scmp.ne.s32.totalorder %s48_s8, %s304_s15  ;;  %p310_p4 = scmp.lt.s32.totalorder %s304_s15, %s304_s15 }
  0x29   :  { %p311_p5 = por %p310_p4, %p309_p3 }
  0x2b   :  { %p312_p6 = pnand %p311_p5, %p305_p2 }
  0x2d   :  { %315 = shalt.err (!%p312_p6)
}
  0x2e   :  { %s352_s16 = smov 16   ;;  %s353_s17 = smov 1  }
  0x2f   :  { %53 = dma.hbm_to_vmem [thread:$0]  %s499_s3, 256, %s48_s8, [#allocation3], %s352_s16, %s352_s16, %s353_s17  }
  0x30   :  { %338 = dma.done.wait [#allocation5], 16  }
  0x31   :  { %339 = vsyncadd [#allocation5], 4294967280 }
  0x32   :  { %340 = dma.done.wait [#allocation6], 16  }
  0x33   :  { %341 = vsyncadd [#allocation6], 4294967280 }
  0x34   :  { %342 = dma.done.wait [#allocation9], 16  }
  0x35   :  { %343 = vsyncadd [#allocation9], 4294967280 }
  0x36   :  { %344 = dma.done.wait [#allocation3], 256  }
  0x37   :  { %345 = vsyncadd [#allocation3], 4294967040 }
  0x38   :  { %66 = sfence }
  0x39   :  { %s67_s20 = sld [smem:[#allocation2]]  ;;  %s242_s21 = sld [smem:[#allocation2 + $0x1]]  ;;  %v71_v0 = vld [vmem:[#allocation10] sm:$0x1]  ;;  %v73_v1 = vld [vmem:[#allocation10 + $0x1] sm:$0x1] }
  0x3a   :  { %s243_s22 = sld [smem:[#allocation2 + $0x2]]  ;;  %s244_s23 = sld [smem:[#allocation2 + $0x3]]  ;;  %v75_v2 = vld [vmem:[#allocation10 + $0x2] sm:$0x1]  ;;  %v77_v5 = vld [vmem:[#allocation10 + $0x3] sm:$0x1] }
  0x3b   :  { %v79_v6 = vld [vmem:[#allocation10 + $0x4] sm:$0x1]  ;;  %v81_v7 = vld [vmem:[#allocation10 + $0x5] sm:$0x1]  ;;  %v83_v12 = vld [vmem:[#allocation10 + $0x6] sm:$0x1] }
  0x3c   :  { %v87_v13 = vld [vmem:[#allocation10 + $0x8] sm:$0x1]  ;;  %v85_v18 = vld [vmem:[#allocation10 + $0x7] sm:$0x1]  ;;  %v89_v23 = vld [vmem:[#allocation10 + $0x9] sm:$0x1] }
  0x3d   :  { %v91_v32 = vld [vmem:[#allocation10 + $0xa] sm:$0x1]  ;;  %v93_v37 = vld [vmem:[#allocation10 + $0xb] sm:$0x1]  ;;  %v95_v42 = vld [vmem:[#allocation10 + $0xc] sm:$0x1] }
  0x3e   :  { %v97_v51 = vld [vmem:[#allocation10 + $0xd] sm:$0x1]  ;;  %v99_v52 = vld [vmem:[#allocation10 + $0xe] sm:$0x1]  ;;  %s447_s3 = sld [smem:[#allocation7]]  ;;  %s450_s24 = sld [smem:[#allocation7 + $0x1]] }
  0x3f   :  { %v413_v3 = vstv %s67_s20  ;;  %v415_v4 = vstv %s242_s21  ;;  %s452_s25 = sld [smem:[#allocation7 + $0x4]]  ;;  %v101_v61 = vld [vmem:[#allocation10 + $0xf] sm:$0x1]  ;;  %s457_s26 = sld [smem:[#allocation7 + $0x5]] }
  0x40   :  { %v103_v8 = vmul.f32 %v413_v3, %v71_v0  ;;  %v105_v9 = vmul.f32 %v415_v4, %v73_v1  ;;  %v419_v10 = vstv %s243_s22  ;;  %v421_v11 = vstv %s244_s23  ;;  %s465_s27 = sld [smem:[#allocation7 + $0x2]]  ;;  %s467_s1 = sld [smem:[#allocation7 + $0x6]] }
  0x41   :  { %v108_v14 = vmul.f32 %v419_v10, %v79_v6  ;;  %v111_v15 = vmul.f32 %v421_v11, %v81_v7  ;;  %v113_v16 = vmul.f32 %v413_v3, %v73_v1  ;;  %v114_v17 = vmul.f32 %v415_v4, %v75_v2  ;;  %s469_s28 = sld [smem:[#allocation7 + $0x3]]  ;;  %s471_s29 = sld [smem:[#allocation7 + $0x7]] }
  0x42   :  { %v106_v19 = vadd.f32 %v105_v9, %v103_v8  ;;  %v116_v20 = vmul.f32 %v419_v10, %v81_v7  ;;  %v118_v21 = vmul.f32 %v421_v11, %v83_v12  ;;  %v120_v22 = vmul.f32 %v413_v3, %v75_v2  ;;  %s198_s30 = sld [smem:[#allocation8]]  ;;  %s252_s5 = sld [smem:[#allocation8 + $0x1]] }
  0x43   :  { %v115_v24 = vadd.f32 %v114_v17, %v113_v16  ;;  %v121_v25 = vmul.f32 %v415_v4, %v77_v5  ;;  %v123_v26 = vmul.f32 %v419_v10, %v83_v12  ;;  %v125_v27 = vmul.f32 %v421_v11, %v85_v18  ;;  %s354_s6 = smov [#allocation11]  }
  0x44   :  { %v109_v28 = vadd.f32 %v108_v14, %v106_v19  ;;  %v127_v29 = vmul.f32 %v413_v3, %v79_v6  ;;  %v128_v30 = vmul.f32 %v415_v4, %v81_v7  ;;  %v130_v31 = vmul.f32 %v419_v10, %v87_v13  ;;  %s227_s0 = sshll.u32 %s354_s6, 4  ;;  %s228_s0 = int_to_ptr.vmem [resolvable:$true] %s227_s0 }
  0x45   :  { %v117_v33 = vadd.f32 %v116_v20, %v115_v24  ;;  %v122_v34 = vadd.f32 %v121_v25, %v120_v22  ;;  %v132_v35 = vmul.f32 %v421_v11, %v89_v23  ;;  %v134_v36 = vmul.f32 %v413_v3, %v81_v7  ;;  %s316_s7 = scalar_lea.vmem %s228_s0, 32  ;;  %p321_p8 = scmp.lt.s32.totalorder %s228_s0, %s228_s0 }
  0x46   :  { %v112_v38 = vadd.f32 %v111_v15, %v109_v28  ;;  %v129_v39 = vadd.f32 %v128_v30, %v127_v29  ;;  %v135_v40 = vmul.f32 %v415_v4, %v83_v12  ;;  %v137_v41 = vmul.f32 %v419_v10, %v89_v23  ;;  %p317_p7 = scmp.ne.s32.totalorder %s228_s0, %s316_s7  ;;  %p322_p9 = scmp.lt.s32.totalorder %s316_s7, %s316_s7 }
  0x47   :  { %v119_v43 = vadd.f32 %v118_v21, %v117_v33  ;;  %v124_v44 = vadd.f32 %v123_v26, %v122_v34  ;;  %v139_v45 = vmul.f32 %v421_v11, %v91_v32  ;;  %v141_v46 = vmul.f32 %v413_v3, %v83_v12 }
  0x48   :  { %v131_v47 = vadd.f32 %v130_v31, %v129_v39  ;;  %v136_v48 = vadd.f32 %v135_v40, %v134_v36  ;;  %v142_v49 = vmul.f32 %v415_v4, %v85_v18  ;;  %v144_v50 = vmul.f32 %v419_v10, %v91_v32  ;;  %p323_p10 = por %p322_p9, %p321_p8 }
  0x49   :  { %v126_v53 = vadd.f32 %v125_v27, %v124_v44  ;;  %v146_v54 = vmul.f32 %v421_v11, %v93_v37  ;;  %v148_v55 = vmul.f32 %v413_v3, %v87_v13  ;;  %v149_v56 = vmul.f32 %v415_v4, %v89_v23 }
  0x4a   :  { %v133_v57 = vadd.f32 %v132_v35, %v131_v47  ;;  %v138_v58 = vadd.f32 %v137_v41, %v136_v48  ;;  %v143_v59 = vadd.f32 %v142_v49, %v141_v46  ;;  %v151_v60 = vmul.f32 %v419_v10, %v95_v42  ;;  %p324_p11 = pnand %p323_p10, %p317_p7 }
  0x4b   :  { %v150_v62 = vadd.f32 %v149_v56, %v148_v55  ;;  %v153_v63 = vmul.f32 %v421_v11, %v97_v51  ;;  %v155_v0 = vmul.f32 %v413_v3, %v89_v23  ;;  %v156_v1 = vmul.f32 %v415_v4, %v91_v32 }
  0x4c   :  { %v140_v2 = vadd.f32 %v139_v45, %v138_v58  ;;  %v145_v5 = vadd.f32 %v144_v50, %v143_v59  ;;  %v158_v6 = vmul.f32 %v419_v10, %v97_v51  ;;  %v160_v7 = vmul.f32 %v421_v11, %v99_v52 }
  0x4d   :  { %v152_v8 = vadd.f32 %v151_v60, %v150_v62  ;;  %v157_v9 = vadd.f32 %v156_v1, %v155_v0  ;;  %v162_v12 = vmul.f32 %v413_v3, %v91_v32  ;;  %v163_v13 = vmul.f32 %v415_v4, %v93_v37 }
  0x4e   :  { %v147_v14 = vadd.f32 %v146_v54, %v145_v5  ;;  %v165_v15 = vmul.f32 %v419_v10, %v99_v52  ;;  %v167_v16 = vmul.f32 %v421_v11, %v101_v61  ;;  %v169_v17 = vmax.f32 %v112_v38, %v119_v43 }
  0x4f   :  { %v154_v18 = vadd.f32 %v153_v63, %v152_v8  ;;  %v159_v19 = vadd.f32 %v158_v6, %v157_v9  ;;  %v164_v20 = vadd.f32 %v163_v13, %v162_v12  ;;  %v170_v3 = vmax.f32 %v133_v57, %v140_v2 }
  0x50   :  { %v173_v21 = vmax.f32 %v119_v43, %v126_v53  ;;  %v174_v4 = vmax.f32 %v140_v2, %v147_v14  ;;  %v184_v24 = vstv %s447_s3  ;;  %v187_v25 = vstv %s450_s24 }
  0x51   :  { %v161_v10 = vadd.f32 %v160_v7, %v159_v19  ;;  %v166_v11 = vadd.f32 %v165_v15, %v164_v20  ;;  %v171_v22 = vmax.f32 %v169_v17, %v170_v3  ;;  %v203_v26 = vstv %s452_s25 }
  0x52   :  { %v175_v23 = vmax.f32 %v173_v21, %v174_v4  ;;  %v206_v30 = vstv %s457_s26  ;;  %v191_v37 = vstv %s465_s27  ;;  %v210_v39 = vstv %s467_s1 }
  0x53   :  { %v168_v27 = vadd.f32 %v167_v16, %v166_v11  ;;  %v172_v28 = vmax.f32 %v171_v22, 0.0  ;;  %v177_v29 = vmax.f32 %v154_v18, %v161_v10  ;;  %v195_v43 = vstv %s469_s28 }
  0x54   :  { %v176_v31 = vmax.f32 %v175_v23, 0.0  ;;  %v214_v45 = vstv %s471_s29  ;;  %v199_v53 = vstv %s198_s30  ;;  %v218_v54 = vstv %s252_s5 }
  0x55   :  { %v178_v32 = vmax.f32 %v170_v3, %v177_v29  ;;  %v180_v33 = vmax.f32 %v161_v10, %v168_v27  ;;  %v185_v34 = vmul.f32 %v184_v24, %v172_v28  ;;  %v204_v35 = vmul.f32 %v203_v26, %v172_v28 }
  0x56   :  { %v188_v36 = vmul.f32 %v187_v25, %v176_v31  ;;  %v207_v38 = vmul.f32 %v206_v30, %v176_v31 }
  0x57   :  { %v179_v40 = vmax.f32 %v178_v32, 0.0  ;;  %v181_v41 = vmax.f32 %v174_v4, %v180_v33 }
  0x58   :  { %v189_v42 = vadd.f32 %v188_v36, %v185_v34  ;;  %v208_v44 = vadd.f32 %v207_v38, %v204_v35 }
  0x59   :  { %v182_v46 = vmax.f32 %v181_v41, 0.0  ;;  %v192_v47 = vmul.f32 %v191_v37, %v179_v40  ;;  %v211_v48 = vmul.f32 %v210_v39, %v179_v40 }
  0x5b   :  { %v193_v49 = vadd.f32 %v192_v47, %v189_v42  ;;  %v196_v50 = vmul.f32 %v195_v43, %v182_v46  ;;  %v212_v51 = vadd.f32 %v211_v48, %v208_v44  ;;  %v215_v52 = vmul.f32 %v214_v45, %v182_v46 }
  0x5d   :  { %v197_v55 = vadd.f32 %v196_v50, %v193_v49  ;;  %v216_v56 = vadd.f32 %v215_v52, %v212_v51 }
  0x5f   :  { %v200_v57 = vadd.f32 %v199_v53, %v197_v55  ;;  %v219_v58 = vadd.f32 %v218_v54, %v216_v56 }
  0x61   :  { %201 = vst [vmem:[#allocation11] sm:$0x1] %v200_v57  ;;  %221 = vst [vmem:[#allocation11 + $0x1] sm:$0x1] %v219_v58 }
  0x62   :  { %327 = shalt.err (!%p324_p11)
}
  0x63   :  { %s328_s10 = scalar_lea.hbm %s500_s4, 32 }
  0x64   :  { %p329_p12 = scmp.ne.s32.totalorder %s500_s4, %s328_s10  ;;  %p332_p13 = scmp.lt.u32.totalorder %s328_s10, %s500_s4 }
  0x66   :  { %p334_p0 = pnand %p332_p13, %p329_p12 }
  0x68   :  { %337 = shalt.err (!%p334_p0)
}
  0x69   :  { %233 = dma.vmem_to_hbm [thread:$0]  %s228_s0, 32, %s500_s4, [#allocation4], %s352_s16, %s352_s16, %s353_s17  }
  0x6a   :  { %346 = dma.done.wait [#allocation4], 32  }
  0x6b   :  { %347 = vsyncadd [#allocation4], 4294967264 }
  0x6c   :  { %237 = vsyncpa [#allocation3], 1 }
  0x6d   :  { %238 = vsyncpa [#allocation4], 1 }
  0x6e   :  { %239 = vsyncpa [#allocation5], 1 }
  0x6f   :  { %240 = vsyncpa [#allocation6], 1 }
  0x70   :  { %241 = vsyncpa [#allocation9], 1 }

</bundles_post_ra>
